<compile_context>
chip_gen: v6e
topology: v6e:2x2x1
jax: 0.10.0
libtpu: 0.0.40
codegen_flags: <defaults>
</compile_context>

<pallas_src>
import functools

import jax
import jax.numpy as jnp
from jax.experimental import pallas as pl
from jax.experimental.pallas import tpu as pltpu

_LANE = 128
_SUBLANE = 8
_MIB = 1024 * 1024
_VMEM_WS_BUDGET = 40 * _MIB   # double-buffered working-set cap (safe on v7x 64 MiB)
_VMEM_LIMIT_CAP = 48 * _MIB
_VMEM_LIMIT_MIN = 32 * _MIB


def _round_up(x, m):
    return ((x + m - 1) // m) * m


def _apply_activation(acc, activation):
    if activation == "relu":
        return jnp.maximum(acc, 0.0)
    if activation == "tanh":
        return jnp.tanh(acc)
    if activation in (None, "identity", "linear"):
        return acc
    raise ValueError(f"unknown activation: {activation}")


# ----------------------------- kernels ------------------------------------- #

def _fe_kernel_single_k(x_ref, w_ref, b_ref, o_ref, *, activation):
    # x_ref: (tm, tk)  w_ref: (tk, tn)  b_ref: (1, tn)  o_ref: (tm, tn)
    acc = jnp.dot(x_ref[...], w_ref[...], preferred_element_type=jnp.float32)
    acc = _apply_activation(acc + b_ref[...], activation)
    o_ref[...] = acc.astype(o_ref.dtype)


def _fe_kernel_multi_k(x_ref, w_ref, b_ref, o_ref, acc_ref, *, activation):
    k = pl.program_id(2)

    @pl.when(k == 0)
    def _init():
        acc_ref[...] = jnp.zeros_like(acc_ref)

    acc_ref[...] += jnp.dot(
        x_ref[...], w_ref[...], preferred_element_type=jnp.float32
    )

    @pl.when(k == pl.num_programs(2) - 1)
    def _finalize():
        acc = _apply_activation(acc_ref[...] + b_ref[...], activation)
        o_ref[...] = acc.astype(o_ref.dtype)


# -------------------------- parameter prep --------------------------------- #

def prepare_feature_extractor_params(weight, bias, *, compute_dtype=jnp.bfloat16):
    """One-time parameter prep (at init, NOT per forward).

    weight: (output_size, input_size) -- PyTorch nn.Linear layout
    bias:   (output_size,)
    Transposes to (input_size, output_size), zero-pads K/N to multiples of 128,
    and casts weights to the compute dtype (bf16 by default -> MXU-native).
    Bias stays fp32 (added after fp32 accumulation).
    """
    out_size, in_size = weight.shape
    if out_size == 0:
        return {"output_size": 0}

    pad_k = _round_up(in_size, _LANE)
    pad_n = _round_up(out_size, _LANE)

    w_t = weight.T.astype(compute_dtype)  # one-time transpose
    w_packed = (
        jnp.zeros((pad_k, pad_n), dtype=compute_dtype)
        .at[:in_size, :out_size]
        .set(w_t)
    )
    b_packed = (
        jnp.zeros((1, pad_n), dtype=jnp.float32)
        .at[0, :out_size]
        .set(bias.astype(jnp.float32))
    )
    return {
        "output_size": out_size,
        "input_size": in_size,
        "w": w_packed,
        "b": b_packed,
        "pad_k": pad_k,
        "pad_n": pad_n,
        "compute_dtype": compute_dtype,
    }


# ------------------------------ forward ------------------------------------ #

def _largest_dividing_tile(pad, cap):
    """Largest multiple of 128 that is <= cap and divides pad (pad % 128 == 0)."""
    t = min(pad, max(cap, _LANE))
    t = max((t // _LANE) * _LANE, _LANE)
    while pad % t != 0:
        t -= _LANE
    return t


def feature_extractor_forward(
    x, params, *, activation="relu", max_tm=256, max_tk=2048, max_tn=1024,
    use_pallas=None,
):
    """Pallas equivalent of FeatureExtractor.forward. x: (..., input_size)."""
    if params["output_size"] == 0:
        # Matches the `torch.zeros(0)` branch -- no kernel needed.
        return jnp.zeros((0,), dtype=x.dtype)

    in_size = params["input_size"]
    out_size = params["output_size"]
    pad_k, pad_n = params["pad_k"], params["pad_n"]
    cd = params["compute_dtype"]
    assert x.shape[-1] == in_size, "input_size mismatch"

    lead = x.shape[:-1]
    x2 = x.reshape(-1, in_size)
    B = x2.shape[0]

    if use_pallas is None:
        # Tiny problems: XLA's fused dot beats kernel-launch + grid overhead.
        use_pallas = (B * in_size * out_size) >= (128 * 128 * 128)

    if not use_pallas:
        acc = (
            x2.astype(jnp.float32)
            @ params["w"][:in_size, :out_size].astype(jnp.float32)
            + params["b"][0, :out_size]
        )
        out = _apply_activation(acc, activation).astype(x.dtype)
        return out.reshape(*lead, out_size)

    cb = jnp.dtype(cd).itemsize          # compute dtype bytes (bf16 -> 2)
    ob = jnp.dtype(x.dtype).itemsize     # output dtype bytes

    tm = min(_round_up(B, _SUBLANE), max_tm)
    tk = _largest_dividing_tile(pad_k, max_tk)
    tn = _largest_dividing_tile(pad_n, max_tn)

    def _working_set(tk_, tn_):
        multi = pad_k // tk_ > 1
        return (
            2 * (tm * tk_ + tk_ * tn_) * cb   # double-buffered x / W tiles
            + 2 * tn_ * 4                      # double-buffered bias tile (fp32)
            + 2 * tm * tn_ * ob                # double-buffered output tile
            + (tm * tn_ * 4 if multi else 0)   # fp32 accumulator scratch
        )

    # Shrink tiles until the working set fits the (v7x-safe) VMEM budget.
    while _working_set(tk, tn) > _VMEM_WS_BUDGET and (tk > _LANE or tn > _LANE):
        if tn >= tk and tn > _LANE:
            tn = _largest_dividing_tile(pad_n, tn - _LANE)
        else:
            tk = _largest_dividing_tile(pad_k, tk - _LANE)

    grid_i = pl.cdiv(B, tm)
    grid_j = pad_n // tn

    # v7x megacore: guarantee >= 2 blocks on a "parallel" axis so both
    # TensorCores get work (harmless extra grid step on 1-TC chips).
    if grid_i == 1 and grid_j == 1 and tn >= 2 * _LANE:
        tn //= 2
        grid_j = pad_n // tn

    grid_k = pad_k // tk
    multi_k = grid_k > 1

    # Cast to compute dtype; zero-pad ONLY the K dimension if needed (required
    # for a correct reduction). M is never padded: a partial last M block only
    # produces garbage rows that are never stored.
    x_c = x2.astype(cd)
    if in_size != pad_k:
        x_c = jnp.pad(x_c, ((0, 0), (0, pad_k - in_size)))

    vmem_limit = int(
        min(max(_VMEM_LIMIT_MIN, _working_set(tk, tn) + 8 * _MIB), _VMEM_LIMIT_CAP)
    )

    cost = pl.CostEstimate(
        flops=2 * B * pad_k * pad_n,
        transcendentals=(B * pad_n if activation == "tanh" else 0),
        bytes_accessed=int(
            x_c.size * cb + params["w"].size * cb + params["b"].size * 4
            + B * pad_n * ob
        ),
    )

    if multi_k:
        kernel = functools.partial(_fe_kernel_multi_k, activation=activation)
        grid = (grid_i, grid_j, grid_k)
        in_specs = [
            pl.BlockSpec((tm, tk), lambda i, j, k: (i, k)),
            pl.BlockSpec((tk, tn), lambda i, j, k: (k, j)),
            pl.BlockSpec((1, tn), lambda i, j, k: (0, j)),
        ]
        out_specs = pl.BlockSpec((tm, tn), lambda i, j, k: (i, j))
        scratch_shapes = [pltpu.VMEM((tm, tn), jnp.float32)]
        dim_sem = ("parallel", "parallel", "arbitrary")
    else:
        kernel = functools.partial(_fe_kernel_single_k, activation=activation)
        grid = (grid_i, grid_j)
        in_specs = [
            pl.BlockSpec((tm, tk), lambda i, j: (i, 0)),
            pl.BlockSpec((tk, tn), lambda i, j: (0, j)),
            pl.BlockSpec((1, tn), lambda i, j: (0, j)),
        ]
        out_specs = pl.BlockSpec((tm, tn), lambda i, j: (i, j))
        scratch_shapes = []
        dim_sem = ("parallel", "parallel")

    out_p = pl.pallas_call(
        kernel,
        out_shape=jax.ShapeDtypeStruct((B, pad_n), x.dtype),
        grid_spec=pltpu.PrefetchScalarGridSpec(
            num_scalar_prefetch=0,
            grid=grid,
            in_specs=in_specs,
            out_specs=out_specs,
            scratch_shapes=scratch_shapes,
        ),
        compiler_params=pltpu.CompilerParams(
            dimension_semantics=dim_sem,
            vmem_limit_bytes=vmem_limit,
        ),
        cost_estimate=cost,
    )(x_c, params["w"], params["b"])

    return out_p[:, :out_size].reshape(*lead, out_size)


# ------------------------------ reference ---------------------------------- #

def _reference(x, weight, bias, activation):
    acc = x.reshape(-1, x.shape[-1]) @ weight.T + bias
    acc = _apply_activation(acc, activation)
    return acc.reshape(*x.shape[:-1], weight.shape[0])


if __name__ == "__main__":
    key = jax.random.PRNGKey(0)

    # --- Case 1: module-sized toy problem (8 x 32 -> 32), bf16 compute, Pallas forced.
    k_x, k_w, k_b = jax.random.split(key, 3)
    batch, input_size, output_size = 8, 32, 32
    x = jax.random.normal(k_x, (batch, input_size), dtype=jnp.float32)
    weight = jax.random.normal(k_w, (output_size, input_size), dtype=jnp.float32) * 0.1
    bias = jax.random.normal(k_b, (output_size,), dtype=jnp.float32) * 0.1

    params_bf16 = prepare_feature_extractor_params(weight, bias)  # bf16 default
    out = feature_extractor_forward(x, params_bf16, activation="relu", use_pallas=True)
    out = jax.block_until_ready(out)
    ref = _reference(x, weight, bias, "relu")
    assert out.shape == (batch, output_size)
    assert jnp.allclose(out, ref, atol=5e-2, rtol=5e-2), "mismatch (bf16, small)"

    # --- Case 2: fp32 compute path, tight tolerance, single-K fast path.
    params_f32 = prepare_feature_extractor_params(weight, bias, compute_dtype=jnp.float32)
    out_f32 = jax.block_until_ready(
        feature_extractor_forward(x, params_f32, activation="relu", use_pallas=True)
    )
    assert jnp.allclose(out_f32, ref, atol=1e-4, rtol=1e-4), "mismatch (fp32, small)"

    # --- Case 3: multi-step K reduction + megacore N split (grid_j >= 2), tanh.
    k_x2, k_w2, k_b2 = jax.random.split(jax.random.PRNGKey(1), 3)
    b2, in2, out2 = 16, 640, 256
    x2 = jax.random.normal(k_x2, (b2, in2), dtype=jnp.float32)
    w2 = jax.random.normal(k_w2, (out2, in2), dtype=jnp.float32) * 0.05
    bia2 = jax.random.normal(k_b2, (out2,), dtype=jnp.float32) * 0.05
    params2 = prepare_feature_extractor_params(w2, bia2)
    out_2 = jax.block_until_ready(
        feature_extractor_forward(
            x2, params2, activation="tanh", max_tk=256, use_pallas=True
        )
    )
    ref2 = _reference(x2, w2, bia2, "tanh")
    assert out_2.shape == (b2, out2)
    assert jnp.allclose(out_2, ref2, atol=5e-2, rtol=5e-2), "mismatch (K-tiled, tanh)"

    # --- Case 4: 3-D input (leading dims flattened like nn.Linear).
    x3 = jax.random.normal(jax.random.PRNGKey(2), (2, 4, input_size), dtype=jnp.float32)
    out_3 = jax.block_until_ready(
        feature_extractor_forward(x3, params_bf16, activation="relu", use_pallas=True)
    )
    ref3 = _reference(x3, weight, bias, "relu")
    assert out_3.shape == (2, 4, output_size)
    assert jnp.allclose(out_3, ref3, atol=5e-2, rtol=5e-2), "mismatch (3-D input)"

    # --- Case 5: output_size == 0 branch (no kernel; returns empty array).
    params0 = prepare_feature_extractor_params(
        jnp.zeros((0, input_size), jnp.float32), jnp.zeros((0,), jnp.float32)
    )
    empty = feature_extractor_forward(x, params0)
    assert empty.shape == (0,)

    # --- Case 6: auto fallback path for tiny problems (plain XLA dot).
    out_fb = feature_extractor_forward(x, params_bf16, activation="relu")  # auto
    assert jnp.allclose(jax.block_until_ready(out_fb), ref, atol=5e-2, rtol=5e-2)

    print("KERNEL_OK")
</pallas_src>

<mosaic_0001>
module attributes {stable_mosaic.version = 11 : i64} {
  func.func @_fe_kernel_single_k(%arg0: i32, %arg1: i32, %arg2: memref<8x128xbf16, #tpu.memory_space<vmem>>, %arg3: memref<128x128xbf16, #tpu.memory_space<vmem>>, %arg4: memref<1x128xf32, #tpu.memory_space<vmem>>, %arg5: memref<8x128xf32, #tpu.memory_space<vmem>>) attributes {dimension_semantics = [#tpu.dimension_semantics<parallel>, #tpu.dimension_semantics<parallel>], iteration_bounds = array<i64: 1, 1>, scalar_prefetch = 0 : i64, scratch_operands = 0 : i64, tpu.core_type = #tpu.core_type<tc>, window_params = [{transform_indices = @transform_0, window_bounds = array<i64: 8, 128>}, {transform_indices = @transform_1, window_bounds = array<i64: 128, 128>}, {transform_indices = @transform_2, window_bounds = array<i64: 1, 128>}, {transform_indices = @transform_3, window_bounds = array<i64: 8, 128>}]} {
    %c0 = arith.constant 0 : index
    %c0_0 = arith.constant 0 : index
    %0 = vector.load %arg2[%c0, %c0_0] : memref<8x128xbf16, #tpu.memory_space<vmem>>, vector<8x128xbf16>
    %c0_1 = arith.constant 0 : index
    %c0_2 = arith.constant 0 : index
    %1 = vector.load %arg3[%c0_1, %c0_2] : memref<128x128xbf16, #tpu.memory_space<vmem>>, vector<128x128xbf16>
    %cst = arith.constant dense<0.000000e+00> : vector<8x128xf32>
    %2 = tpu.matmul %0, %1, %cst {dimension_numbers = #tpu.dot_dimension_numbers<[1], [0], [0], [1], [0, 0, 1, 1], [], []>} : vector<8x128xbf16>, vector<128x128xbf16>, vector<8x128xf32> -> vector<8x128xf32>
    %c0_3 = arith.constant 0 : index
    %c0_4 = arith.constant 0 : index
    %3 = vector.load %arg4[%c0_3, %c0_4] : memref<1x128xf32, #tpu.memory_space<vmem>>, vector<1x128xf32>
    %4 = vector.broadcast %3 : vector<1x128xf32> to vector<8x128xf32>
    %5 = arith.addf %2, %4 : vector<8x128xf32>
    %cst_5 = arith.constant 0.000000e+00 : f32
    %6 = vector.broadcast %cst_5 : f32 to vector<8x128xf32>
    %7 = arith.maximumf %5, %6 : vector<8x128xf32>
    %c0_6 = arith.constant 0 : index
    %c0_7 = arith.constant 0 : index
    %8 = vector.load %arg5[%c0_6, %c0_7] : memref<8x128xf32, #tpu.memory_space<vmem>>, vector<8x128xf32>
    tpu.vector_store %arg5[%c0_6, %c0_7], %7 {strides = array<i32>} : memref<8x128xf32, #tpu.memory_space<vmem>>, vector<8x128xf32>,
    return
  }
  func.func @transform_0(%arg0: i32, %arg1: i32) -> (i32, i32) {
    %c0_i32 = arith.constant 0 : i32
    %c0_i32_0 = arith.constant 0 : i32
    return %arg0, %c0_i32 : i32, i32
  }
  func.func @transform_1(%arg0: i32, %arg1: i32) -> (i32, i32) {
    %c0_i32 = arith.constant 0 : i32
    %c0_i32_0 = arith.constant 0 : i32
    return %c0_i32, %arg1 : i32, i32
  }
  func.func @transform_2(%arg0: i32, %arg1: i32) -> (i32, i32) {
    %c0_i32 = arith.constant 0 : i32
    %c0_i32_0 = arith.constant 0 : i32
    return %c0_i32, %arg1 : i32, i32
  }
  func.func @transform_3(%arg0: i32, %arg1: i32) -> (i32, i32) {
    %c0_i32 = arith.constant 0 : i32
    return %arg0, %arg1 : i32, i32
  }
}

</mosaic_0001>

<bundles_post_ra>
// kernel: tpu_custom_call.1
= control target key start
LH: loop header
LB: loop body
LE: loop exit
PB: predicated region body
PF: predicated region fallthrough
CT: control target
= control target key end

     0   :  { %8 = vsyncpa [#allocation3], 0  ;;  %s330_s0 = inlined_call_operand.hbm [shape: bf16[8,128], index: 0, kind: input, shape index: {}]   ;;  %s331_s1 = inlined_call_operand.hbm [shape: bf16[128,128], index: 1, kind: input, shape index: {}]   ;;  %s332_s2 = inlined_call_operand.vmem [shape: f32[1,128], index: 2, kind: input, shape index: {}]   ;;  %s333_s3 = inlined_call_operand.hbm [shape: f32[8,128], index: 3, kind: output, shape index: {}]  }
   0x1   :  { %9 = vsyncpa [#allocation6], 0 }
   0x2   :  { %10 = vsyncpa [#allocation4], 0  ;;  %s291_s12 = smov [#allocation2]   ;;  %s292_s14 = smov [#allocation5]  }
   0x3   :  { %s17_s13 = sshll.u32 %s291_s12, 4  ;;  %s26_s15 = sshll.u32 %s292_s14, 4  ;;  %s18_s13 = int_to_ptr.vmem [resolvable:$true] %s17_s13  ;;  %s27_s15 = int_to_ptr.vmem [resolvable:$true] %s26_s15 }
   0x4   :  { %s233_s16 = scalar_lea.vmem %s18_s13, 64  ;;  %p238_p1 = scmp.lt.s32.totalorder %s18_s13, %s18_s13 }
   0x5   :  { %p234_p0 = scmp.ne.s32.totalorder %s18_s13, %s233_s16  ;;  %p239_p2 = scmp.lt.s32.totalorder %s233_s16, %s233_s16 }
   0x7   :  { %p240_p3 = por %p239_p2, %p238_p1 }
   0x9   :  { %p241_p4 = pnand %p240_p3, %p234_p0 }
   0xb   :  { %244 = shalt.err (!%p241_p4)
}
   0xc   :  { %20 = dma.hbm_to_vmem [thread:$0]  %s330_s0, 64, %s18_s13, [#allocation3]  }
   0xd   :  { %s253_s19 = scalar_lea.vmem %s27_s15, 1024  ;;  %p258_p6 = scmp.lt.s32.totalorder %s27_s15, %s27_s15 }
   0xe   :  { %p254_p5 = scmp.ne.s32.totalorder %s27_s15, %s253_s19  ;;  %p259_p7 = scmp.lt.s32.totalorder %s253_s19, %s253_s19 }
  0x10   :  { %p260_p8 = por %p259_p7, %p258_p6 }
  0x12   :  { %p261_p9 = pnand %p260_p8, %p254_p5 }
  0x14   :  { %264 = shalt.err (!%p261_p9)
}
  0x15   :  { %s293_s20 = smov 64   ;;  %s294_s21 = smov 4  }
  0x16   :  { %32 = dma.hbm_to_vmem [thread:$0]  %s331_s1, 1024, %s27_s15, [#allocation6], %s293_s20, %s293_s20, %s294_s21  }
  0x17   :  { %285 = dma.done.wait [#allocation3], 64  }
  0x18   :  { %286 = vsyncadd [#allocation3], 4294967232 }
  0x19   :  { %287 = dma.done.wait [#allocation6], 1024  }
  0x1a   :  { %288 = vsyncadd [#allocation6], 4294966272  ;;  %v295_v0 = vmov 0.0   ;;  %vm296_vm0 = vmmov 0   ;;  %v217_v1 = vld [vmem:[#allocation5 + $0x38] sm:$0xff]   ;;  %v218_v2 = vld [vmem:[#allocation5 + $0x30] sm:$0xff]  }
  0x1b   :  { %190 = vmatprep.subr.bf16.mxu0 %v295_v0  ;;  %206 = vmatprep.mubr.msk.bf16.mxu0 %vm296_vm0, %v295_v0  ;;  %v219_v3 = vld [vmem:[#allocation5 + $0x28] sm:$0xff]   ;;  %v220_v4 = vld [vmem:[#allocation5 + $0x20] sm:$0xff]   ;;  %v221_v5 = vld [vmem:[#allocation5 + $0x18] sm:$0xff]   ;;  %s297_s24 = smov [#allocation7]  }
  0x1c   :  { %191 = vmatpush3.bf16.msra.mxu0 %v217_v1  ;;  %v222_v6 = vld [vmem:[#allocation5 + $0x10] sm:$0xff]   ;;  %v223_v7 = vld [vmem:[#allocation5 + $0x8] sm:$0xff]   ;;  %v224_v8 = vld [vmem:[#allocation5] sm:$0xff]   ;;  %s162_s25 = sshll.u32 %s297_s24, 4  ;;  %s163_s25 = int_to_ptr.vmem [resolvable:$true] %s162_s25 }
  0x1d   :  { %192 = vmatprep.subr.bf16.mxu0 %v295_v0  ;;  %v42_v9 = vld [vmem:[#allocation2] sm:$0xf]  ;;  %s265_s26 = scalar_lea.vmem %s163_s25, 128  ;;  %p270_p11 = scmp.lt.s32.totalorder %s163_s25, %s163_s25 }
  0x1e   :  { %v172_v10 = vld [vmem:[%s332_s2] ss:$0 sm:$0xff]  ;;  %p266_p10 = scmp.ne.s32.totalorder %s163_s25, %s265_s26  ;;  %p271_p12 = scmp.lt.s32.totalorder %s265_s26, %s265_s26 }
  0x20   :  { %193 = vmatpush3.bf16.msra.mxu0 %v218_v2  ;;  %p272_p13 = por %p271_p12, %p270_p11 }
  0x21   :  { %194 = vmatprep.subr.bf16.mxu0 %v295_v0 }
  0x22   :  { %p273_p0 = pnand %p272_p13, %p266_p10 }
  0x24   :  { %195 = vmatpush3.bf16.msra.mxu0 %v219_v3 }
  0x25   :  { %196 = vmatprep.subr.bf16.mxu0 %v295_v0 }
  0x28   :  { %197 = vmatpush3.bf16.msra.mxu0 %v220_v4 }
  0x29   :  { %198 = vmatprep.subr.bf16.mxu0 %v295_v0 }
  0x2c   :  { %199 = vmatpush3.bf16.msra.mxu0 %v221_v5 }
  0x2d   :  { %200 = vmatprep.subr.bf16.mxu0 %v295_v0 }
  0x30   :  { %201 = vmatpush3.bf16.msra.mxu0 %v222_v6 }
  0x31   :  { %202 = vmatprep.subr.bf16.mxu0 %v295_v0 }
  0x34   :  { %203 = vmatpush3.bf16.msra.mxu0 %v223_v7 }
  0x35   :  { %204 = vmatprep.subr.bf16.mxu0 %v295_v0 }
  0x38   :  { %205 = vmatpush3.bf16.msra.mxu0 %v224_v8 }
  0x3b   :  { %207 = vmatmul.mubr.bf16.vlgmr.msra.gmra.mxu0 %v42_v9 }
  0xfb   :  { %v148_v11 = vpop.f32.mrf.mxu0 }
  0xfc   :  { %v149_v12 = vadd.f32 %v172_v10, %v148_v11 }
  0xfd   :  { %v208_v13 = vpop.f32.mrf.mxu0 }
  0xfe   :  { %v154_v14 = vmax.f32 %v149_v12, 0.0 }
  0xff   :  { %v151_v15 = vpop.f32.mrf.mxu0 }
 0x100   :  { %155 = vst [vmem:[#allocation7] sm:$0xff] %v154_v14 }
 0x101   :  { %v209_v16 = vpop.f32.mrf.mxu0 }
 0x102   :  { %276 = shalt.err (!%p273_p0)
}
 0x103   :  { %165 = dma.vmem_to_hbm [thread:$0]  %s163_s25, 128, %s333_s3, [#allocation4]  }
 0x104   :  { %289 = dma.done.wait [#allocation4], 128  }
 0x105   :  { %290 = vsyncadd [#allocation4], 4294967168 }
 0x106   :  { %169 = vsyncpa [#allocation3], 1 }
 0x107   :  { %170 = vsyncpa [#allocation6], 1 }
 0x108   :  { %171 = vsyncpa [#allocation4], 1 }

</bundles_post_ra>
